<compile_context>
chip_gen: v5e
topology: v5e:2x2
jax: 0.10.0
libtpu: 0.0.40
codegen_flags: <defaults>
</compile_context>

<pallas_src>
import functools

import jax
import jax.numpy as jnp
import numpy as np
from jax import lax
from jax.experimental import pallas as pl
from jax.experimental.pallas import tpu as pltpu


# ---------------------------------------------------------------------------
# Pallas kernel: one grid step == one batch element.
# ---------------------------------------------------------------------------
def _self_attention_kernel(x_ref, mask_ref,
                           wqkv_ref, bqkv_ref,
                           wo_ref, bo_ref,
                           o_ref,
                           attn_scratch,
                           *, num_heads, head_dim, head_scaling):
    D = num_heads * head_dim

    x = x_ref[...]                               # (S, D)  (batch dim squeezed)
    pad = mask_ref[...] != 0                     # (1, S) bool, True = masked key

    # Additive mask, computed once per grid step. Finite -1e30 (instead of -inf) so a
    # fully-masked row gives exp(0)=1 everywhere instead of NaN; for partially masked
    # rows exp(-1e30 - m) underflows to exactly 0, matching masked_fill(-inf) + softmax.
    neg = jnp.where(pad, jnp.float32(-1e30), jnp.float32(0.0))   # (1, S)

    # Fused Q/K/V projection: one wide MXU matmul + one bias add.
    qkv = jnp.dot(x, wqkv_ref[...], preferred_element_type=jnp.float32) + bqkv_ref[...]  # (S, 3D)

    inv_scale = jnp.float32(1.0 / head_scaling)
    q = qkv[:, 0:D] * inv_scale                  # scale once, not per head on (S,S)
    k = qkv[:, D:2 * D]
    v = qkv[:, 2 * D:3 * D]

    # Static (fully unrolled) loop over heads; each head writes its output slice
    # directly into the VMEM scratch -> no concatenate epilogue.
    for h in range(num_heads):
        sl = slice(h * head_dim, (h + 1) * head_dim)
        qh = q[:, sl]                            # (S, hd)
        kh = k[:, sl]                            # (S, hd)
        vh = v[:, sl]                            # (S, hd)

        # Contract the head dim on both sides: logits[i, j] = sum_d qh[i, d] * kh[j, d].
        logits = lax.dot_general(qh, kh, (((1,), (1,)), ((), ())),
                                 preferred_element_type=jnp.float32)   # (S, S)
        logits = logits + neg                    # broadcast (1,S) -> (S,S)

        # Numerically-stable softmax along the key axis.
        m = jnp.max(logits, axis=-1, keepdims=True)
        e = jnp.exp(logits - m)
        denom = jnp.sum(e, axis=-1, keepdims=True)
        a = e * pl.reciprocal(denom, approx=True)

        attn_scratch[:, sl] = jnp.dot(a, vh, preferred_element_type=jnp.float32)

    out = jnp.dot(attn_scratch[...], wo_ref[...],
                  preferred_element_type=jnp.float32) + bo_ref[...]
    o_ref[...] = out.astype(o_ref.dtype)


# ---------------------------------------------------------------------------
# Wrapper
# ---------------------------------------------------------------------------
def self_attention_pallas(x, pad_mask, params, *, num_heads):
    B, S, D = x.shape
    head_dim = D // num_heads
    head_scaling = float(head_dim) ** 0.5

    # Fuse Q/K/V weights: (out, in) -> transpose -> concat along the output axis.
    wqkv = jnp.concatenate([params["wq"].T, params["wk"].T, params["wv"].T], axis=1)  # (D, 3D)
    bqkv = jnp.concatenate([params["bq"], params["bk"], params["bv"]]).reshape(1, 3 * D)
    wo_t = params["wo"].T                        # (D, D)
    bo = params["bo"].reshape(1, D)

    # pad_mask (B, 1, 1, S) bool -> (B, 1, S) int32 for the kernel.
    mask_i32 = pad_mask.reshape(B, 1, S).astype(jnp.int32)

    kernel = functools.partial(
        _self_attention_kernel,
        num_heads=num_heads,
        head_dim=head_dim,
        head_scaling=head_scaling,
    )

    full = lambda b: (0, 0)  # noqa: E731  (weights / biases: same block every grid step)

    return pl.pallas_call(
        kernel,
        out_shape=jax.ShapeDtypeStruct((B, S, D), x.dtype),
        grid_spec=pltpu.PrefetchScalarGridSpec(
            num_scalar_prefetch=0,
            grid=(B,),
            in_specs=[
                # x: one batch row per grid step; leading batch dim squeezed.
                pl.BlockSpec((pl.Squeezed(), S, D), lambda b: (b, 0, 0)),
                # pad mask row for this batch element.
                pl.BlockSpec((pl.Squeezed(), 1, S), lambda b: (b, 0, 0)),
                pl.BlockSpec((D, 3 * D), full),   # fused Wqkv^T
                pl.BlockSpec((1, 3 * D), full),   # fused bqkv
                pl.BlockSpec((D, D), full),       # Wo^T
                pl.BlockSpec((1, D), full),       # bo
            ],
            out_specs=pl.BlockSpec((pl.Squeezed(), S, D), lambda b: (b, 0, 0)),
            scratch_shapes=[pltpu.VMEM((S, D), jnp.float32)],   # per-head outputs land here
        ),
        compiler_params=pltpu.CompilerParams(
            dimension_semantics=("parallel",),    # batch steps independent -> megacore
            vmem_limit_bytes=64 * 1024 * 1024,
        ),
    )(x, mask_i32, wqkv, bqkv, wo_t, bo)


# ---------------------------------------------------------------------------
# Pure-JAX reference (mirrors the PyTorch forward) for correctness checking.
# ---------------------------------------------------------------------------
def self_attention_reference(x, pad_mask, params, *, num_heads):
    B, S, D = x.shape
    head_dim = D // num_heads
    head_scaling = float(head_dim) ** 0.5

    def linear(t, w, b):
        return t @ w.T + b

    def to_heads(t):
        return t.reshape(B, S, num_heads, head_dim).transpose(0, 2, 1, 3)  # (B,H,S,hd)

    q = to_heads(linear(x, params["wq"], params["bq"]))
    k = to_heads(linear(x, params["wk"], params["bk"]))
    v = to_heads(linear(x, params["wv"], params["bv"]))

    logits = jnp.einsum("bhqd,bhkd->bhqk", q, k) / head_scaling
    logits = jnp.where(pad_mask, -jnp.inf, logits)
    a = jax.nn.softmax(logits, axis=-1)
    o = jnp.einsum("bhqk,bhkd->bhqd", a, v)
    o = o.transpose(0, 2, 1, 3).reshape(B, S, D)
    return linear(o, params["wo"], params["bo"])


# ---------------------------------------------------------------------------
# Main
# ---------------------------------------------------------------------------
if __name__ == "__main__":
    B, S, D, H = 2, 8, 32, 4   # batch, seq_len, embed_dim, num_heads  (head_dim = 8)

    key = jax.random.PRNGKey(0)
    keys = jax.random.split(key, 10)

    scale = 1.0 / (D ** 0.5)
    params = {
        "wq": jax.random.normal(keys[0], (D, D), jnp.float32) * scale,
        "bq": jax.random.normal(keys[1], (D,), jnp.float32) * 0.1,
        "wk": jax.random.normal(keys[2], (D, D), jnp.float32) * scale,
        "bk": jax.random.normal(keys[3], (D,), jnp.float32) * 0.1,
        "wv": jax.random.normal(keys[4], (D, D), jnp.float32) * scale,
        "bv": jax.random.normal(keys[5], (D,), jnp.float32) * 0.1,
        "wo": jax.random.normal(keys[6], (D, D), jnp.float32) * scale,
        "bo": jax.random.normal(keys[7], (D,), jnp.float32) * 0.1,
    }

    x = jax.random.normal(keys[8], (B, S, D), jnp.float32)

    # Key-padding mask: True = padded key. Batch 0: no padding, batch 1: last 2 keys padded.
    valid_lens = jnp.array([S, S - 2])
    key_idx = jnp.arange(S)[None, :]                                  # (1, S)
    pad_mask = (key_idx >= valid_lens[:, None]).reshape(B, 1, 1, S)   # (B,1,1,S) bool

    out = self_attention_pallas(x, pad_mask, params, num_heads=H)
    out = jax.block_until_ready(out)

    ref = self_attention_reference(x, pad_mask, params, num_heads=H)
    # Slightly loose tolerance: softmax normalization uses the EUP approximate reciprocal.
    np.testing.assert_allclose(np.asarray(out), np.asarray(ref), rtol=5e-3, atol=5e-3)

    print("KERNEL_OK")
</pallas_src>

<mosaic_0001>
module attributes {stable_mosaic.version = 11 : i64} {
  func.func @_self_attention_kernel(%arg0: i32, %arg1: memref<1x8x32xf32, #tpu.memory_space<vmem>>, %arg2: memref<1x1x8xi32, #tpu.memory_space<vmem>>, %arg3: memref<32x96xf32, #tpu.memory_space<vmem>>, %arg4: memref<1x96xf32, #tpu.memory_space<vmem>>, %arg5: memref<32x32xf32, #tpu.memory_space<vmem>>, %arg6: memref<1x32xf32, #tpu.memory_space<vmem>>, %arg7: memref<1x8x32xf32, #tpu.memory_space<vmem>>, %arg8: memref<8x32xf32, #tpu.memory_space<vmem>>) attributes {dimension_semantics = [#tpu.dimension_semantics<parallel>], iteration_bounds = array<i64: 2>, scalar_prefetch = 0 : i64, scratch_operands = 1 : i64, tpu.core_type = #tpu.core_type<tc>, window_params = [{transform_indices = @transform_0, window_bounds = array<i64: 1, 8, 32>}, {transform_indices = @transform_1, window_bounds = array<i64: 1, 1, 8>}, {pipeline_mode = #tpu.pipeline_mode<synchronous>, transform_indices = @transform_2, window_bounds = array<i64: 32, 96>}, {pipeline_mode = #tpu.pipeline_mode<synchronous>, transform_indices = @transform_3, window_bounds = array<i64: 1, 96>}, {pipeline_mode = #tpu.pipeline_mode<synchronous>, transform_indices = @transform_4, window_bounds = array<i64: 32, 32>}, {pipeline_mode = #tpu.pipeline_mode<synchronous>, transform_indices = @transform_5, window_bounds = array<i64: 1, 32>}, {transform_indices = @transform_6, window_bounds = array<i64: 1, 8, 32>}]} {
    %c0 = arith.constant 0 : index
    %c0_0 = arith.constant 0 : index
    %c0_1 = arith.constant 0 : index
    %0 = vector.load %arg1[%c0, %c0_0, %c0_1] : memref<1x8x32xf32, #tpu.memory_space<vmem>>, vector<1x8x32xf32>
    %1 = vector.shape_cast %0 : vector<1x8x32xf32> to vector<8x32xf32>
    %c0_2 = arith.constant 0 : index
    %c0_3 = arith.constant 0 : index
    %c0_4 = arith.constant 0 : index
    %2 = vector.load %arg2[%c0_2, %c0_3, %c0_4] : memref<1x1x8xi32, #tpu.memory_space<vmem>>, vector<1x1x8xi32>
    %3 = vector.shape_cast %2 : vector<1x1x8xi32> to vector<1x8xi32>
    %c0_i32 = arith.constant 0 : i32
    %4 = vector.broadcast %c0_i32 : i32 to vector<1x8xi32>
    %5 = arith.cmpi ne, %3, %4 : vector<1x8xi32>
    %cst = arith.constant -1.000000e+30 : f32
    %cst_5 = arith.constant 0.000000e+00 : f32
    %6 = vector.broadcast %cst : f32 to vector<1x8xf32>
    %7 = vector.broadcast %cst_5 : f32 to vector<1x8xf32>
    %8 = arith.select %5, %6, %7 : vector<1x8xi1>, vector<1x8xf32>
    %c0_6 = arith.constant 0 : index
    %c0_7 = arith.constant 0 : index
    %9 = vector.load %arg3[%c0_6, %c0_7] : memref<32x96xf32, #tpu.memory_space<vmem>>, vector<32x96xf32>
    %cst_8 = arith.constant dense<0.000000e+00> : vector<8x96xf32>
    %10 = tpu.matmul %1, %9, %cst_8 {dimension_numbers = #tpu.dot_dimension_numbers<[1], [0], [0], [1], [0, 0, 1, 1], [], []>} : vector<8x32xf32>, vector<32x96xf32>, vector<8x96xf32> -> vector<8x96xf32>
    %c0_9 = arith.constant 0 : index
    %c0_10 = arith.constant 0 : index
    %11 = vector.load %arg4[%c0_9, %c0_10] : memref<1x96xf32, #tpu.memory_space<vmem>>, vector<1x96xf32>
    %12 = vector.broadcast %11 : vector<1x96xf32> to vector<8x96xf32>
    %13 = arith.addf %10, %12 : vector<8x96xf32>
    %14 = vector.extract_strided_slice %13 {offsets = [0, 0], sizes = [8, 32], strides = [1, 1]} : vector<8x96xf32> to vector<8x32xf32>
    %cst_11 = arith.constant 0.353553385 : f32
    %15 = vector.broadcast %cst_11 : f32 to vector<8x32xf32>
    %16 = arith.mulf %14, %15 : vector<8x32xf32>
    %17 = vector.extract_strided_slice %13 {offsets = [0, 32], sizes = [8, 32], strides = [1, 1]} : vector<8x96xf32> to vector<8x32xf32>
    %18 = vector.extract_strided_slice %13 {offsets = [0, 64], sizes = [8, 32], strides = [1, 1]} : vector<8x96xf32> to vector<8x32xf32>
    %19 = vector.extract_strided_slice %16 {offsets = [0, 0], sizes = [8, 8], strides = [1, 1]} : vector<8x32xf32> to vector<8x8xf32>
    %20 = vector.extract_strided_slice %17 {offsets = [0, 0], sizes = [8, 8], strides = [1, 1]} : vector<8x32xf32> to vector<8x8xf32>
    %21 = vector.extract_strided_slice %18 {offsets = [0, 0], sizes = [8, 8], strides = [1, 1]} : vector<8x32xf32> to vector<8x8xf32>
    %cst_12 = arith.constant dense<0.000000e+00> : vector<8x8xf32>
    %22 = tpu.matmul %19, %20, %cst_12 {dimension_numbers = #tpu.dot_dimension_numbers<[1], [1], [0], [0], [0, 0, 1, 0], [], []>} : vector<8x8xf32>, vector<8x8xf32>, vector<8x8xf32> -> vector<8x8xf32>
    %23 = vector.broadcast %8 : vector<1x8xf32> to vector<8x8xf32>
    %24 = arith.addf %22, %23 : vector<8x8xf32>
    %cst_13 = arith.constant dense<0xFF800000> : vector<8xf32>
    %25 = vector.multi_reduction <maximumf>, %24, %cst_13 [1] : vector<8x8xf32> to vector<8xf32>
    %26 = vector.shape_cast %25 : vector<8xf32> to vector<8x1xf32>
    %27 = vector.broadcast %26 : vector<8x1xf32> to vector<8x8xf32>
    %28 = arith.subf %24, %27 : vector<8x8xf32>
    %29 = math.exp %28 : vector<8x8xf32>
    %cst_14 = arith.constant dense<0.000000e+00> : vector<8xf32>
    %30 = vector.multi_reduction <add>, %29, %cst_14 [1] : vector<8x8xf32> to vector<8xf32>
    %31 = vector.shape_cast %30 : vector<8xf32> to vector<8x1xf32>
    %32 = tpu.reciprocal %31 {approx = true} : vector<8x1xf32> -> vector<8x1xf32>
    %33 = vector.broadcast %32 : vector<8x1xf32> to vector<8x8xf32>
    %34 = arith.mulf %29, %33 : vector<8x8xf32>
    %cst_15 = arith.constant dense<0.000000e+00> : vector<8x8xf32>
    %35 = tpu.matmul %34, %21, %cst_15 {dimension_numbers = #tpu.dot_dimension_numbers<[1], [0], [0], [1], [0, 0, 1, 1], [], []>} : vector<8x8xf32>, vector<8x8xf32>, vector<8x8xf32> -> vector<8x8xf32>
    %c0_16 = arith.constant 0 : index
    %c0_17 = arith.constant 0 : index
    %36 = vector.load %arg8[%c0_16, %c0_17] : memref<8x32xf32, #tpu.memory_space<vmem>>, vector<8x8xf32>
    tpu.vector_store %arg8[%c0_16, %c0_17], %35 {strides = array<i32>} : memref<8x32xf32, #tpu.memory_space<vmem>>, vector<8x8xf32>,
    %37 = vector.extract_strided_slice %16 {offsets = [0, 8], sizes = [8, 8], strides = [1, 1]} : vector<8x32xf32> to vector<8x8xf32>
    %38 = vector.extract_strided_slice %17 {offsets = [0, 8], sizes = [8, 8], strides = [1, 1]} : vector<8x32xf32> to vector<8x8xf32>
    %39 = vector.extract_strided_slice %18 {offsets = [0, 8], sizes = [8, 8], strides = [1, 1]} : vector<8x32xf32> to vector<8x8xf32>
    %cst_18 = arith.constant dense<0.000000e+00> : vector<8x8xf32>
    %40 = tpu.matmul %37, %38, %cst_18 {dimension_numbers = #tpu.dot_dimension_numbers<[1], [1], [0], [0], [0, 0, 1, 0], [], []>} : vector<8x8xf32>, vector<8x8xf32>, vector<8x8xf32> -> vector<8x8xf32>
    %41 = vector.broadcast %8 : vector<1x8xf32> to vector<8x8xf32>
    %42 = arith.addf %40, %41 : vector<8x8xf32>
    %cst_19 = arith.constant dense<0xFF800000> : vector<8xf32>
    %43 = vector.multi_reduction <maximumf>, %42, %cst_19 [1] : vector<8x8xf32> to vector<8xf32>
    %44 = vector.shape_cast %43 : vector<8xf32> to vector<8x1xf32>
    %45 = vector.broadcast %44 : vector<8x1xf32> to vector<8x8xf32>
    %46 = arith.subf %42, %45 : vector<8x8xf32>
    %47 = math.exp %46 : vector<8x8xf32>
    %cst_20 = arith.constant dense<0.000000e+00> : vector<8xf32>
    %48 = vector.multi_reduction <add>, %47, %cst_20 [1] : vector<8x8xf32> to vector<8xf32>
    %49 = vector.shape_cast %48 : vector<8xf32> to vector<8x1xf32>
    %50 = tpu.reciprocal %49 {approx = true} : vector<8x1xf32> -> vector<8x1xf32>
    %51 = vector.broadcast %50 : vector<8x1xf32> to vector<8x8xf32>
    %52 = arith.mulf %47, %51 : vector<8x8xf32>
    %cst_21 = arith.constant dense<0.000000e+00> : vector<8x8xf32>
    %53 = tpu.matmul %52, %39, %cst_21 {dimension_numbers = #tpu.dot_dimension_numbers<[1], [0], [0], [1], [0, 0, 1, 1], [], []>} : vector<8x8xf32>, vector<8x8xf32>, vector<8x8xf32> -> vector<8x8xf32>
    %c0_22 = arith.constant 0 : index
    %c8 = arith.constant 8 : index
    %54 = vector.load %arg8[%c0_22, %c8] : memref<8x32xf32, #tpu.memory_space<vmem>>, vector<8x8xf32>
    tpu.vector_store %arg8[%c0_22, %c8], %53 {strides = array<i32>} : memref<8x32xf32, #tpu.memory_space<vmem>>, vector<8x8xf32>,
    %55 = vector.extract_strided_slice %16 {offsets = [0, 16], sizes = [8, 8], strides = [1, 1]} : vector<8x32xf32> to vector<8x8xf32>
    %56 = vector.extract_strided_slice %17 {offsets = [0, 16], sizes = [8, 8], strides = [1, 1]} : vector<8x32xf32> to vector<8x8xf32>
    %57 = vector.extract_strided_slice %18 {offsets = [0, 16], sizes = [8, 8], strides = [1, 1]} : vector<8x32xf32> to vector<8x8xf32>
    %cst_23 = arith.constant dense<0.000000e+00> : vector<8x8xf32>
    %58 = tpu.matmul %55, %56, %cst_23 {dimension_numbers = #tpu.dot_dimension_numbers<[1], [1], [0], [0], [0, 0, 1, 0], [], []>} : vector<8x8xf32>, vector<8x8xf32>, vector<8x8xf32> -> vector<8x8xf32>
    %59 = vector.broadcast %8 : vector<1x8xf32> to vector<8x8xf32>
    %60 = arith.addf %58, %59 : vector<8x8xf32>
    %cst_24 = arith.constant dense<0xFF800000> : vector<8xf32>
    %61 = vector.multi_reduction <maximumf>, %60, %cst_24 [1] : vector<8x8xf32> to vector<8xf32>
    %62 = vector.shape_cast %61 : vector<8xf32> to vector<8x1xf32>
    %63 = vector.broadcast %62 : vector<8x1xf32> to vector<8x8xf32>
    %64 = arith.subf %60, %63 : vector<8x8xf32>
    %65 = math.exp %64 : vector<8x8xf32>
    %cst_25 = arith.constant dense<0.000000e+00> : vector<8xf32>
    %66 = vector.multi_reduction <add>, %65, %cst_25 [1] : vector<8x8xf32> to vector<8xf32>
    %67 = vector.shape_cast %66 : vector<8xf32> to vector<8x1xf32>
    %68 = tpu.reciprocal %67 {approx = true} : vector<8x1xf32> -> vector<8x1xf32>
    %69 = vector.broadcast %68 : vector<8x1xf32> to vector<8x8xf32>
    %70 = arith.mulf %65, %69 : vector<8x8xf32>
    %cst_26 = arith.constant dense<0.000000e+00> : vector<8x8xf32>
    %71 = tpu.matmul %70, %57, %cst_26 {dimension_numbers = #tpu.dot_dimension_numbers<[1], [0], [0], [1], [0, 0, 1, 1], [], []>} : vector<8x8xf32>, vector<8x8xf32>, vector<8x8xf32> -> vector<8x8xf32>
    %c0_27 = arith.constant 0 : index
    %c16 = arith.constant 16 : index
    %72 = vector.load %arg8[%c0_27, %c16] : memref<8x32xf32, #tpu.memory_space<vmem>>, vector<8x8xf32>
    tpu.vector_store %arg8[%c0_27, %c16], %71 {strides = array<i32>} : memref<8x32xf32, #tpu.memory_space<vmem>>, vector<8x8xf32>,
    %73 = vector.extract_strided_slice %16 {offsets = [0, 24], sizes = [8, 8], strides = [1, 1]} : vector<8x32xf32> to vector<8x8xf32>
    %74 = vector.extract_strided_slice %17 {offsets = [0, 24], sizes = [8, 8], strides = [1, 1]} : vector<8x32xf32> to vector<8x8xf32>
    %75 = vector.extract_strided_slice %18 {offsets = [0, 24], sizes = [8, 8], strides = [1, 1]} : vector<8x32xf32> to vector<8x8xf32>
    %cst_28 = arith.constant dense<0.000000e+00> : vector<8x8xf32>
    %76 = tpu.matmul %73, %74, %cst_28 {dimension_numbers = #tpu.dot_dimension_numbers<[1], [1], [0], [0], [0, 0, 1, 0], [], []>} : vector<8x8xf32>, vector<8x8xf32>, vector<8x8xf32> -> vector<8x8xf32>
    %77 = vector.broadcast %8 : vector<1x8xf32> to vector<8x8xf32>
    %78 = arith.addf %76, %77 : vector<8x8xf32>
    %cst_29 = arith.constant dense<0xFF800000> : vector<8xf32>
    %79 = vector.multi_reduction <maximumf>, %78, %cst_29 [1] : vector<8x8xf32> to vector<8xf32>
    %80 = vector.shape_cast %79 : vector<8xf32> to vector<8x1xf32>
    %81 = vector.broadcast %80 : vector<8x1xf32> to vector<8x8xf32>
    %82 = arith.subf %78, %81 : vector<8x8xf32>
    %83 = math.exp %82 : vector<8x8xf32>
    %cst_30 = arith.constant dense<0.000000e+00> : vector<8xf32>
    %84 = vector.multi_reduction <add>, %83, %cst_30 [1] : vector<8x8xf32> to vector<8xf32>
    %85 = vector.shape_cast %84 : vector<8xf32> to vector<8x1xf32>
    %86 = tpu.reciprocal %85 {approx = true} : vector<8x1xf32> -> vector<8x1xf32>
    %87 = vector.broadcast %86 : vector<8x1xf32> to vector<8x8xf32>
    %88 = arith.mulf %83, %87 : vector<8x8xf32>
    %cst_31 = arith.constant dense<0.000000e+00> : vector<8x8xf32>
    %89 = tpu.matmul %88, %75, %cst_31 {dimension_numbers = #tpu.dot_dimension_numbers<[1], [0], [0], [1], [0, 0, 1, 1], [], []>} : vector<8x8xf32>, vector<8x8xf32>, vector<8x8xf32> -> vector<8x8xf32>
    %c0_32 = arith.constant 0 : index
    %c24 = arith.constant 24 : index
    %90 = vector.load %arg8[%c0_32, %c24] : memref<8x32xf32, #tpu.memory_space<vmem>>, vector<8x8xf32>
    tpu.vector_store %arg8[%c0_32, %c24], %89 {strides = array<i32>} : memref<8x32xf32, #tpu.memory_space<vmem>>, vector<8x8xf32>,
    %c0_33 = arith.constant 0 : index
    %c0_34 = arith.constant 0 : index
    %91 = vector.load %arg8[%c0_33, %c0_34] : memref<8x32xf32, #tpu.memory_space<vmem>>, vector<8x32xf32>
    %c0_35 = arith.constant 0 : index
    %c0_36 = arith.constant 0 : index
    %92 = vector.load %arg5[%c0_35, %c0_36] : memref<32x32xf32, #tpu.memory_space<vmem>>, vector<32x32xf32>
    %cst_37 = arith.constant dense<0.000000e+00> : vector<8x32xf32>
    %93 = tpu.matmul %91, %92, %cst_37 {dimension_numbers = #tpu.dot_dimension_numbers<[1], [0], [0], [1], [0, 0, 1, 1], [], []>} : vector<8x32xf32>, vector<32x32xf32>, vector<8x32xf32> -> vector<8x32xf32>
    %c0_38 = arith.constant 0 : index
    %c0_39 = arith.constant 0 : index
    %94 = vector.load %arg6[%c0_38, %c0_39] : memref<1x32xf32, #tpu.memory_space<vmem>>, vector<1x32xf32>
    %95 = vector.broadcast %94 : vector<1x32xf32> to vector<8x32xf32>
    %96 = arith.addf %93, %95 : vector<8x32xf32>
    %c0_40 = arith.constant 0 : index
    %c0_41 = arith.constant 0 : index
    %c0_42 = arith.constant 0 : index
    %97 = vector.load %arg7[%c0_40, %c0_41, %c0_42] : memref<1x8x32xf32, #tpu.memory_space<vmem>>, vector<1x8x32xf32>
    %98 = vector.shape_cast %97 : vector<1x8x32xf32> to vector<8x32xf32>
    %99 = vector.shape_cast %96 : vector<8x32xf32> to vector<1x8x32xf32>
    tpu.vector_store %arg7[%c0_40, %c0_41, %c0_42], %99 {strides = array<i32>} : memref<1x8x32xf32, #tpu.memory_space<vmem>>, vector<1x8x32xf32>,
    return
  }
  func.func @transform_0(%arg0: i32) -> (i32, i32, i32) {
    %c0_i32 = arith.constant 0 : i32
    %c0_i32_0 = arith.constant 0 : i32
    %c0_i32_1 = arith.constant 0 : i32
    return %arg0, %c0_i32, %c0_i32_0 : i32, i32, i32
  }
  func.func @transform_1(%arg0: i32) -> (i32, i32, i32) {
    %c0_i32 = arith.constant 0 : i32
    %c0_i32_0 = arith.constant 0 : i32
    %c0_i32_1 = arith.constant 0 : i32
    return %arg0, %c0_i32, %c0_i32_0 : i32, i32, i32
  }
  func.func @transform_2(%arg0: i32) -> (i32, i32) {
    %c0_i32 = arith.constant 0 : i32
    %c0_i32_0 = arith.constant 0 : i32
    %c0_i32_1 = arith.constant 0 : i32
    return %c0_i32, %c0_i32_0 : i32, i32
  }
  func.func @transform_3(%arg0: i32) -> (i32, i32) {
    %c0_i32 = arith.constant 0 : i32
    %c0_i32_0 = arith.constant 0 : i32
    %c0_i32_1 = arith.constant 0 : i32
    return %c0_i32, %c0_i32_0 : i32, i32
  }
  func.func @transform_4(%arg0: i32) -> (i32, i32) {
    %c0_i32 = arith.constant 0 : i32
    %c0_i32_0 = arith.constant 0 : i32
    %c0_i32_1 = arith.constant 0 : i32
    return %c0_i32, %c0_i32_0 : i32, i32
  }
  func.func @transform_5(%arg0: i32) -> (i32, i32) {
    %c0_i32 = arith.constant 0 : i32
    %c0_i32_0 = arith.constant 0 : i32
    %c0_i32_1 = arith.constant 0 : i32
    return %c0_i32, %c0_i32_0 : i32, i32
  }
  func.func @transform_6(%arg0: i32) -> (i32, i32, i32) {
    %c0_i32 = arith.constant 0 : i32
    %c0_i32_0 = arith.constant 0 : i32
    %c0_i32_1 = arith.constant 0 : i32
    return %arg0, %c0_i32, %c0_i32_0 : i32, i32, i32
  }
}

</mosaic_0001>

<bundles_post_ra>
// kernel: tpu_custom_call.1
= control target key start
LH: loop header
LB: loop body
LE: loop exit
PB: predicated region body
PF: predicated region fallthrough
CT: control target
= control target key end

     0   :  { %s1431_s0 = inlined_call_operand.hbm [shape: f32[2,8,32], index: 0, kind: input, shape index: {}]   ;;  %s1432_s1 = inlined_call_operand.hbm [shape: s32[2,1,8], index: 1, kind: input, shape index: {}]   ;;  %s1433_s2 = inlined_call_operand.hbm [shape: f32[32,96], index: 2, kind: input, shape index: {}]   ;;  %s1434_s3 = inlined_call_operand.vmem [shape: f32[1,96], index: 3, kind: input, shape index: {}]   ;;  %s1435_s4 = inlined_call_operand.hbm [shape: f32[32,32], index: 4, kind: input, shape index: {}]   ;;  %s1436_s5 = inlined_call_operand.vmem [shape: f32[1,32], index: 5, kind: input, shape index: {}]   ;;  %s1437_s6 = inlined_call_operand.hbm [shape: f32[2,8,32], index: 6, kind: output, shape index: {}]  }
   0x1   :  { %1439 = sst [smem:[#allocation19_spill]] %s1433_s2 }
   0x2   :  { %1440 = sst [smem:[#allocation20_spill]] %s1435_s4 }
   0x3   :  { %11 = vsyncpa [#allocation4], 0 }
   0x4   :  { %13 = vsyncpa [#allocation4 + $0x1], 0 }
   0x5   :  { %14 = vsyncpa [#allocation7], 0 }
   0x6   :  { %16 = vsyncpa [#allocation7 + $0x1], 0 }
   0x7   :  { %17 = vsyncpa [#allocation10], 0 }
   0x8   :  { %18 = vsyncpa [#allocation5], 0 }
   0x9   :  { %20 = vsyncpa [#allocation5 + $0x1], 0  ;;  %s1205_s21 = smov 0   ;;  %s1207_s22 = smov 0  }
   0xa   :  { %s1209_s23 = smov 0   ;;  %s1211_s24 = smov 0  }
   0xb LB: > { %1441 = sst [smem:[#allocation17_spill]] %s1145_s23  ;;  %s1229_s28 = sadd.s32 4294967295, %s1149_s24   ;;  %s1149_s24 = sphi %s1211_s24, %s1456_s24   ;;  %s1145_s23 = sphi %s1209_s23, %s1453_s23   ;;  %s1141_s22 = sphi %s1207_s22, %s1455_s22   ;;  %s1137_s21 = sphi %s1205_s21, %s1454_s21  }
   0xc   : > { %s1442_s2 = sld [smem:[#allocation19_spill]]  ;;  %p815_p0 = scmp.ge.s32.totalorder %s1149_s24, 1 }
   0xd   : > { %p47_p1 = scmp.eq.s32.totalorder %s1229_s28, 0  ;;  %p193_p2 = scmp.lt.s32.totalorder %s1149_s24, 3 }
   0xe   : > { %s1151_s30 = smov [#allocation8]   ;;  %s1444_s4 = sld [smem:[#allocation20_spill]] }
   0xf   : > { %p1234_p3 = pnand %p815_p0, %p193_p2  ;;  %s206_s7 = sshll.u32 %s1151_s30, 4  ;;  %s207_s7 = int_to_ptr.vmem [resolvable:$true] %s206_s7 }
  0x10   : > { %s1152_s11 = smov [#allocation9]   ;;  %s1153_s13 = smov 128  }
  0x11   : > { %p858_p4 = pneg %p1234_p3  ;;  %s223_s12 = sshll.u32 %s1152_s11, 4  ;;  %s224_s12 = int_to_ptr.vmem [resolvable:$true] %s223_s12 }
  0x12   : > { %s204_s27 = sshll.u32 %s1442_s2, 4  ;;  %s1154_s14 = smov 8   ;;  %s205_s27 = int_to_ptr.hbm [resolvable:$true] %s204_s27 }
  0x13   : > { %p859_p6 = pnand %p858_p4, %p47_p1  ;;  %s814_s15 = sadd.s32 4294967294, %s1149_s24  }
  0x14   : > { %s221_s10 = sshll.u32 %s1444_s4, 4  ;;  %s1248_s16 = sadd.s32 1, %s1149_s24   ;;  %s222_s10 = int_to_ptr.hbm [resolvable:$true] %s221_s10 }
  0x15   : > { %861 = dma.hbm_to_vmem [thread:$0]  (!%p859_p6), %s205_s27, 512, %s207_s7, [#allocation7], %s1153_s13, %s1153_s13, %s1154_s14  }
  0x16   : > { %864 = dma.hbm_to_vmem [thread:$0]  (!%p859_p6), %s222_s10, 512, %s224_s12, [#allocation10], %s1153_s13, %s1153_s13, %s1154_s14  }
  0x17   : > { %s30_s17 = ssub.s32 %s1149_s24, %s1248_s16  ;;  %s33_s18 = sadd.s32 1, %s1145_s23 }
  0x18   : > { %p31_p7 = scmp.eq.s32.totalorder %s30_s17, 0  ;;  %p40_p8 = scmp.ne.s32.totalorder %s1145_s23, %s1141_s22 }
  0x19   : > { %p41_p9 = scmp.eq.s32.totalorder %s1149_s24, 0  ;;  %p46_p10 = scmp.ne.s32.totalorder %s1141_s22, %s1137_s21 }
  0x1a   : > { %s1259_s19 = scalar_select %p31_p7, %s1145_s23, %s33_s18  }
  0x1b   : > { %p1261_p11 = por %p41_p9, %p40_p8  ;;  %p1267_p12 = por %p47_p1, %p46_p10 }
  0x1c   : > { %1445 = sst [smem:[#allocation18_spill]] %s1259_s19  ;;  %p180_p13 = scmp.eq.s32.totalorder %s1229_s28, 1 }
  0x1d   : > { %p186_p0 = scmp.eq.s32.totalorder %s814_s15, 1  ;;  %p878_p2 = scmp.lt.s32.totalorder %s1149_s24, 2 }
  0x1e   : > { %s1274_s26 = sand.u32 1, %s1145_s23   ;;  %p1276_p4 = por %p180_p13, %p40_p8 }
  0x1f   : > { %p1280_p6 = por %p186_p0, %p46_p10  ;;  %s819_s7 = sshll.u32 %s1274_s26, 3 }
  0x20   : > { %s820_s8 = sshll.u32 %s1149_s24, 3  ;;  %s244_s12 = scalar_lea.vmem [#allocation3], %s819_s7 }
  0x21   : > { %s248_s11 = scalar_lea.hbm %s1431_s0, %s820_s8  ;;  %s252_s13 = sshll.u32 %s244_s12, 4  ;;  %s253_s13 = int_to_ptr.vmem [resolvable:$true] %s252_s13 }
  0x22   : > { %s250_s14 = sshll.u32 %s248_s11, 4  ;;  %p1291_p7 = pnand %p878_p2, %p1261_p11  ;;  %s251_s14 = int_to_ptr.hbm [resolvable:$true] %s250_s14 }
  0x23   : > { %s259_s17 = sand.u32 1, %s1149_s24   ;;  %s241_s18 = scalar_lea.sflag [#allocation4], %s1274_s26 }
  0x24   : > { %s1011_s2 = sshra.s32 %s251_s14, 4  ;;  %p1015_p9 = pneg %p1291_p7  ;;  %s1012_s2 = int_to_ptr.hbm [resolvable:$true] %s1011_s2 }
  0x25   : > { %s1013_s4 = scalar_lea.hbm %s1012_s2, 8  ;;  %s1018_s8 = scalar_lea.hbm %s1431_s0, 16 }
  0x26   : > { %p1014_p8 = scmp.ne.s32.totalorder %s1012_s2, %s1013_s4  ;;  %p1019_p11 = scmp.lt.s32.totalorder %s1012_s2, %s1431_s0 }
  0x27   : > { %p1020_p0 = scmp.lt.s32.totalorder %s1018_s8, %s1013_s4 }
  0x28   : > { %p1016_p10 = pnand %p1015_p9, %p1014_p8 }
  0x29   : > { %p1021_p2 = por %p1020_p0, %p1019_p11 }
  0x2a   : > { %p1017_p13 = pneg %p1016_p10 }
  0x2c   : > { %p1022_p5 = pnand %p1021_p2, %p1017_p13 }
  0x2e   : > { %1025 = shalt.err (!%p1022_p5)
}
  0x2f   : > { %868 = dma.hbm_to_vmem [thread:$0]  (!%p1291_p7), %s251_s14, 128, %s253_s13, %s241_s18  }
  0x30   : > { %s265_s19 = scalar_lea.hbm %s1432_s1, %s1149_s24  ;;  %s262_s7 = scalar_lea.vmem [#allocation6], %s1274_s26 }
  0x31   : > { %s269_s20 = sshll.u32 %s262_s7, 4  ;;  %s267_s23 = sshll.u32 %s265_s19, 4  ;;  %s270_s20 = int_to_ptr.vmem [resolvable:$true] %s269_s20  ;;  %s268_s23 = int_to_ptr.hbm [resolvable:$true] %s267_s23 }
  0x32   : > { %s260_s2 = scalar_lea.sflag [#allocation7], %s259_s17  ;;  %s1041_s4 = sshra.s32 %s268_s23, 4  ;;  %s1042_s4 = int_to_ptr.hbm [resolvable:$true] %s1041_s4 }
  0x33   : > { %s1043_s8 = scalar_lea.hbm %s1042_s4, 1  ;;  %s1048_s14 = scalar_lea.hbm %s1432_s1, 2 }
  0x34   : > { %p1044_p5 = scmp.ne.s32.totalorder %s1042_s4, %s1043_s8  ;;  %p1049_p13 = scmp.lt.s32.totalorder %s1042_s4, %s1432_s1 }
  0x35   : > { %p1050_p11 = scmp.lt.s32.totalorder %s1048_s14, %s1043_s8 }
  0x36   : > { %p1046_p8 = pnand %p1044_p5, %p1015_p9 }
  0x37   : > { %p1051_p0 = por %p1050_p11, %p1049_p13 }
  0x38   : > { %p1047_p10 = pneg %p1046_p8 }
  0x3a   : > { %p1052_p2 = pnand %p1051_p0, %p1047_p10 }
  0x3c   : > { %1055 = shalt.err (!%p1052_p2)
}
  0x3d   : > { %871 = dma.hbm_to_vmem [thread:$0]  (!%p1291_p7), %s268_s23, 16, %s270_s20, %s260_s2  }
  0x3e   : > { %278 = sbr.rel (%p1234_p3) target bundleno = 1135 (0x46f), region = 44  ;;  %s1329_s19 = sand.u32 (!%p1234_p3), 1, %s1141_s22  }
  0x3f   : > { %s822_s26 = sshll.u32 (!%p1234_p3), %s1329_s19, 3  ;;  %s281_s17 = scalar_lea.sflag (!%p1234_p3), [#allocation4], %s1329_s19 }
  0x40   : > { %s284_s11 = scalar_lea.vmem (!%p1234_p3), [#allocation3], %s822_s26 }
  0x43   : > { %1116 = dma.done.wait (%p1267_p12), %s281_s17, 128  }
  0x44   : > { %1118 = vsyncadd (%p1267_p12), %s281_s17, 4294967168  ;;  %s290_s23 = sand.u32 1, %s1229_s28   ;;  %s293_s15 = scalar_lea.vmem [#allocation6], %s1329_s19 }
  0x45   : > { %s291_s29 = scalar_lea.sflag [#allocation7], %s290_s23 }
  0x46   : > { %1120 = dma.done.wait (%p1267_p12), %s291_s29, 16  }
  0x47   : > { %1122 = vsyncadd (%p1267_p12), %s291_s29, 4294967280 }
  0x48   : > { %1124 = dma.done.wait (%p47_p1), [#allocation7], 512  }
  0x49   : > { %1126 = vsyncadd (%p47_p1), [#allocation7], 4294966784 }
  0x4a   : > { %1128 = dma.done.wait (%p47_p1), [#allocation10], 512  }
  0x4b   : > { %1130 = vsyncadd (%p47_p1), [#allocation10], 4294966784  ;;  %v344_v0 = vld [vmem:[#allocation8 + $0x18] sm:$0xff]  ;;  %v343_v1 = vld [vmem:[#allocation8 + $0x10] sm:$0xff]  ;;  %vm349_vm0 = vcmask 261120   ;;  %s1155_s7 = smov 72  }
  0x4c   : > { %365 = vmatpush.msra.mxu0 %v344_v0  ;;  %v342_v2 = vld [vmem:[#allocation8 + $0x8] sm:$0xff]  ;;  %v341_v3 = vld [vmem:[#allocation8] sm:$0xff]  ;;  %s1156_s20 = smov 96   ;;  %s1157_s2 = smov 120   ;;  %vm380_vm1 = vcmask 64512   ;;  %v1162_v17 = vmov 0.0  }
  0x4d   : > { %v337_v4 = vld [vmem:[%s284_s11] sm:$0xff]  ;;  %v933_v5 = vld [vmem:[%s1434_s3] ss:$0 sm:$0xff]  ;;  %s1158_s4 = smov 88   ;;  %s1159_s8 = smov 112   ;;  %vm513_vm3 = vcmask 130112  }
  0x4e   : > { %366 = vmatpush.msra.mxu0 %v343_v1  ;;  %s1160_s9 = smov 80   ;;  %s1161_s13 = smov 104   ;;  %v338_v16 = vld [vmem:[%s293_s15] sm:$0x1]  ;;  %vm584_vm4 = vcmask 195712   ;;  %vm655_vm5 = vcmask 261312  }
  0x4f   : > { %vm339_vm2 = vcmp.ne.s32.totalorder %v338_v16, 0  ;;  %s1163_s14 = smov 64   ;;  %s1164_s18 = smov 40   ;;  %v934_v16 = vld [vmem:[%s1436_s5] ss:$0 sm:$0xff] }
  0x50   : > { %367 = vmatpush.msra.mxu0 %v342_v2  ;;  %v340_v18 = vsel %vm339_vm2, -1e+30, %v1162_v17  ;;  %s1165_s10 = smov 56   ;;  %s1166_s17 = smov 48  }
  0x51   : > { %v375_v19 = vperm.slane %v340_v18, 0  ;;  %s1167_s11 = smov 16   ;;  %s1168_s23 = smov 8  }
  0x52   : > { %368 = vmatpush.msra.mxu0 %v341_v3  ;;  %s1169_s29 = smov 24   ;;  %s841_s15 = sshll.u32 %s1229_s28, 3 }
  0x53   : > { %826 = vmatmul.msk.f32.vlgmr.msra.gmra.mxu0 %vm349_vm0, %v337_v4  ;;  %s691_s28 = scalar_lea.sflag [#allocation5], %s1329_s19 }
  0xd0   : > { %v370_v6 = vpop.f32.mrf.mxu0 }
  0xd1   : > { %v1357_v7 = vadd.f32 %v933_v5, %v370_v6 }
  0xd3   : > { %588 = vrot.lane.b32.xlu2 %v1357_v7, %s1155_s7  ;;  %378 = vrot.lane.b32.xlu0 %v1357_v7, %s1156_s20  ;;  %v373_v8 = vmul.f32 0.35355338, %v1357_v7  ;;  %s701_s7 = scalar_lea.hbm %s1437_s6, %s841_s15 }
  0xd5   : > { %444 = vrot.lane.b32.xlu1 %v373_v8, %s1157_s2 }
  0xdb   : > { %446 = vrot.lane.b32.xlu0 %v1357_v7, %s1158_s4  ;;  %515 = vrot.lane.b32.xlu2 %v373_v8, %s1159_s8  ;;  %s336_s4 = scalar_lea.vmem [#allocation11], %s822_s26  ;;  %s1091_s26 = scalar_lea.hbm %s1437_s6, 16 }
  0xdc   : > { %s703_s8 = sshll.u32 %s336_s4, 4  ;;  %s704_s8 = int_to_ptr.vmem [resolvable:$true] %s703_s8 }
  0xdd   : > { %517 = vrot.lane.b32.xlu1 %v1357_v7, %s1160_s9  ;;  %s705_s9 = sshll.u32 %s701_s7, 4  ;;  %s706_s9 = int_to_ptr.hbm [resolvable:$true] %s705_s9 }
  0xe3   : > { %586 = vrot.lane.b32.xlu0 %v373_v8, %s1161_s13  ;;  %s1085_s13 = sshra.s32 %s706_s9, 4  ;;  %s1086_s13 = int_to_ptr.hbm [resolvable:$true] %s1085_s13 }
  0xe4   : > { %p1092_p7 = scmp.lt.s32.totalorder %s1086_s13, %s1437_s6 }
 0x12d   : > { %v589_v9 = vpop.permute.xlu2 %588 }
 0x12e   : > { %836 = vmatpush.xpose.msk.msrb.mxu0 %vm380_vm1, %v589_v9  ;;  %v660_v9 = vld [vmem:[#allocation9 + $0x10] sm:$0xff] }
 0x135   : > { %v516_v14 = vpop.permute.xlu2 %515 }
 0x145   : > { %v379_v10 = vpop.permute.xlu0 %378 }
 0x146   : > { %827 = vmatpush.xpose.msk.msra.mxu1 %vm380_vm1, %v379_v10  ;;  %v659_v10 = vld [vmem:[#allocation9 + $0x8] sm:$0xff] }
 0x147   : > { %v445_v11 = vpop.permute.xlu1 %444 }
 0x149   : > { %828 = vmatmul.msk.f32.vlgmr.msra.gmra.mxu1 %vm380_vm1, %v373_v8  ;;  %v661_v8 = vld [vmem:[#allocation9 + $0x18] sm:$0xff] }
 0x14d   : > { %v447_v12 = vpop.permute.xlu0 %446 }
 0x14e   : > { %830 = vmatpush.xpose.msk.msra.mxu3 %vm380_vm1, %v447_v12 }
 0x14f   : > { %v518_v13 = vpop.permute.xlu1 %517 }
 0x150   : > { %833 = vmatpush.xpose.msk.msrb.mxu1 %vm380_vm1, %v518_v13 }
 0x151   : > { %831 = vmatmul.msk.f32.vlgmr.msra.gmra.mxu3 %vm380_vm1, %v445_v11  ;;  %v658_v11 = vld [vmem:[#allocation9] sm:$0xff] }
 0x153   : > { %834 = vmatmul.msk.f32.vlgmr.msrb.gmra.mxu1 %vm380_vm1, %v516_v14 }
 0x154   : > { %681 = vmatpush.msra.mxu1 %v661_v8 }
 0x155   : > { %v587_v15 = vpop.permute.xlu0 %586 }
 0x156   : > { %837 = vmatmul.msk.f32.vlgmr.msrb.gmra.mxu0 %vm380_vm1, %v587_v15  ;;  %682 = vmatpush.msra.mxu1 %v660_v9 }
 0x158   : > { %683 = vmatpush.msra.mxu1 %v659_v10 }
 0x15a   : > { %684 = vmatpush.msra.mxu1 %v658_v11 }
 0x1c6   : > { %v403_v20 = vpop.f32.mrf.mxu1 }
 0x1c7   : > { %v404_v21 = vadd.f32 %v403_v20, %v375_v19 }
 0x1c9   : > { %v406_v22 = vsel %vm380_vm1, %v404_v21, -inf }
 0x1ca   : > { %407 = vmax.xlane.f32.xlu1 %v406_v22 }
 0x1d0   : > { %v540_v23 = vpop.f32.mrf.mxu1 }
 0x1d1   : > { %v541_v24 = vadd.f32 %v540_v23, %v375_v19 }
 0x1d3   : > { %v543_v25 = vsel %vm380_vm1, %v541_v24, -inf  ;;  %v611_v29 = vpop.f32.mrf.mxu0 }
 0x1d4   : > { %v469_v26 = vpop.f32.mrf.mxu3  ;;  %544 = vmax.xlane.f32.xlu0 %v543_v25  ;;  %v612_v30 = vadd.f32 %v611_v29, %v375_v19 }
 0x1d5   : > { %v470_v27 = vadd.f32 %v469_v26, %v375_v19 }
 0x1d6   : > { %v614_v31 = vsel %vm380_vm1, %v612_v30, -inf }
 0x1d7   : > { %v472_v28 = vsel %vm380_vm1, %v470_v27, -inf }
 0x1d8   : > { %473 = vmax.xlane.f32.xlu2 %v472_v28 }
 0x1e0   : > { %615 = vmax.xlane.f32.xlu2 %v614_v31 }
 0x1e8   : > { %417 = vrot.lane.b32.xlu0 %v1357_v7, %s1163_s14  ;;  %s1087_s14 = scalar_lea.hbm %s1086_s13, 8 }
 0x1e9   : > { %p1088_p1 = scmp.ne.s32.totalorder %s1086_s13, %s1087_s14  ;;  %p1093_p9 = scmp.lt.s32.totalorder %s1091_s26, %s1087_s14 }
 0x1eb   : > { %p1089_p3 = pnand %p1088_p1, %p1276_p4  ;;  %p1094_p5 = por %p1093_p9, %p1092_p7 }
 0x1ed   : > { %p1090_p12 = pneg %p1089_p3 }
 0x1ef   : > { %p1095_p8 = pnand %p1094_p5, %p1090_p12 }
 0x1f0   : > { %625 = vrot.lane.b32.xlu0 %v1357_v7, %s1164_s18 }
 0x23d   : > { %v408_v32 = vpop.xlane.xlu1 %407 }
 0x23e   : > { %v409_v33 = vsub.f32 %v404_v21, %v408_v32 }
 0x240   : > { %v410_v34 = vmul.f32 1.442695, %v409_v33 }
 0x242   : > { %935 = vpow2.f32 %v410_v34 }
 0x247   : > { %v545_v35 = vpop.xlane.xlu0 %544 }
 0x248   : > { %v936_v36 = vpop.eup %935  ;;  %v546_v37 = vsub.f32 %v541_v24, %v545_v35 }
 0x249   : > { %v412_v38 = vsel %vm380_vm1, %v936_v36, 0.0 }
 0x24a   : > { %v547_v39 = vmul.f32 1.442695, %v546_v37  ;;  %413 = vadd.xlane.f32.xlu1 %v412_v38 }
 0x24b   : > { %v474_v40 = vpop.xlane.xlu2 %473 }
 0x24c   : > { %937 = vpow2.f32 %v547_v39  ;;  %v475_v45 = vsub.f32 %v470_v27, %v474_v40 }
 0x24e   : > { %v476_v47 = vmul.f32 1.442695, %v475_v45 }
 0x252   : > { %v938_v41 = vpop.eup %937 }
 0x253   : > { %v616_v42 = vpop.xlane.xlu2 %615  ;;  %v549_v43 = vsel %vm380_vm1, %v938_v41, 0.0 }
 0x254   : > { %v617_v44 = vsub.f32 %v612_v30, %v616_v42  ;;  %550 = vadd.xlane.f32.xlu1 %v549_v43 }
 0x256   : > { %v618_v46 = vmul.f32 1.442695, %v617_v44 }
 0x258   : > { %939 = vpow2.f32 %v618_v46 }
 0x259   : > { %941 = vpow2.f32 %v476_v47 }
 0x25a   : > { %v418_v48 = vpop.permute.xlu0 %417 }
 0x25b   : > { %438 = vmatpush.msra.mxu2 %v418_v48 }
 0x25e   : > { %v940_v49 = vpop.eup %939 }
 0x25f   : > { %v620_v50 = vsel %vm380_vm1, %v940_v49, 0.0  ;;  %v942_v51 = vpop.eup %941 }
 0x260   : > { %621 = vadd.xlane.f32.xlu2 %v620_v50  ;;  %v478_v52 = vsel %vm380_vm1, %v942_v51, 0.0 }
 0x262   : > { %v626_v61 = vpop.permute.xlu0 %625 }
 0x268   : > { %479 = vadd.xlane.f32.xlu2 %v478_v52 }
 0x26d   : > { %483 = vrot.lane.b32.xlu1 %v1357_v7, %s1165_s10 }
 0x280   : > { %554 = vrot.lane.b32.xlu2 %v1357_v7, %s1166_s17 }
 0x2bd   : > { %v414_v53 = vpop.xlane.xlu1 %413 }
 0x2be   : > { %943 = vrcp.f32 %v414_v53 }
 0x2c4   : > { %v944_v54 = vpop.eup %943 }
 0x2c5   : > { %v416_v55 = vmul.f32 %v944_v54, %v936_v36 }
 0x2c7   : > { %829 = vmatmul.msk.f32.vlgmr.msra.gmra.mxu2 %vm380_vm1, %v416_v55  ;;  %v551_v57 = vpop.xlane.xlu1 %550 }
 0x2c8   : > { %945 = vrcp.f32 %v551_v57 }
 0x2ce   : > { %v946_v60 = vpop.eup %945 }
 0x2cf   : > { %v553_v1 = vmul.f32 %v946_v60, %v938_v41 }
 0x2d3   : > { %v622_v56 = vpop.xlane.xlu2 %621 }
 0x2db   : > { %v480_v58 = vpop.xlane.xlu2 %479 }
 0x2dc   : > { %947 = vrcp.f32 %v480_v58 }
 0x2dd   : > { %949 = vrcp.f32 %v622_v56 }
 0x2df   : > { %v484_v59 = vpop.permute.xlu1 %483 }
 0x2e0   : > { %504 = vmatpush.msrb.mxu2 %v484_v59 }
 0x2e2   : > { %646 = vmatpush.msra.mxu2 %v626_v61  ;;  %v948_v62 = vpop.eup %947 }
 0x2e3   : > { %v555_v63 = vpop.permute.xlu2 %554  ;;  %v482_v0 = vmul.f32 %v948_v62, %v942_v51  ;;  %v950_v2 = vpop.eup %949 }
 0x2e4   : > { %575 = vmatpush.msrb.mxu3 %v555_v63  ;;  %v624_v3 = vmul.f32 %v950_v2, %v940_v49 }
 0x2e5   : > { %832 = vmatmul.msk.f32.vlgmr.msrb.gmra.mxu2 %vm380_vm1, %v482_v0  ;;  %835 = vmatmul.msk.f32.vlgmr.msrb.gmra.mxu3 %vm380_vm1, %v553_v1 }
 0x2ed   : > { %838 = vmatmul.msk.f32.vlgmr.msra.gmra.mxu2 %vm380_vm1, %v624_v3 }
 0x34a   : > { %v440_v4 = vpop.f32.mrf.mxu2 }
 0x34b   : > { %443 = vst.msk [vmem:[#allocation2] sm:$0xff] %vm380_vm1, %v440_v4 }
 0x368   : > { %v506_v5 = vpop.f32.mrf.mxu2  ;;  %v577_v6 = vpop.f32.mrf.mxu3 }
 0x369   : > { %581 = vrot.lane.b32.xlu1 %v577_v6, %s1167_s11  ;;  %510 = vrot.lane.b32.xlu0 %v506_v5, %s1168_s23 }
 0x370   : > { %v648_v7 = vpop.f32.mrf.mxu2 }
 0x371   : > { %652 = vrot.lane.b32.xlu0 %v648_v7, %s1169_s29 }
 0x3db   : > { %v511_v12 = vpop.permute.xlu0 %510  ;;  %v582_v13 = vpop.permute.xlu1 %581 }
 0x3dc   : > { %514 = vst.msk [vmem:[#allocation2] sm:$0xff] %vm513_vm3, %v511_v12 }
 0x3dd   : > { %585 = vst.msk [vmem:[#allocation2] sm:$0xff] %vm584_vm4, %v582_v13 }
 0x3e3   : > { %v653_v14 = vpop.permute.xlu0 %652 }
 0x3e4   : > { %656 = vst.msk [vmem:[#allocation2] sm:$0xff] %vm655_vm5, %v653_v14 }
 0x3eb   : > { %v657_v15 = vld [vmem:[#allocation2] sm:$0xff] }
 0x3ec   : > { %839 = vmatmul.msk.f32.vlgmr.msra.gmra.mxu1 %vm349_vm0, %v657_v15 }
 0x469   : > { %v686_v17 = vpop.f32.mrf.mxu1 }
 0x46a   : > { %v687_v18 = vadd.f32 %v934_v16, %v686_v17 }
 0x46c   : > { %689 = vst.msk [vmem:[%s336_s4] sm:$0xff] %vm349_vm0, %v687_v18 }
 0x46d   : > { %1098 = shalt.err (!%p1095_p8)
}
 0x46e   : > { %856 = dma.vmem_to_hbm [thread:$0]  (%p1276_p4), %s704_s8, 128, %s706_s9, %s691_s28  }
 0x46f PF: > { %s717_s19 = sand.u32 1, %s1137_s21   ;;  %p1451_p10 = scmp.ge.s32.totalorder %s1149_s24, 2 }
 0x470   : > { %s718_s23 = scalar_lea.sflag [#allocation5], %s717_s19 }
 0x471   : > { %p873_p13 = pnand %p1451_p10, %p1280_p6 }
 0x473   : > { %p874_p11 = pneg %p873_p13 }
 0x475   : > { %1132 = dma.done.wait (%p874_p11), %s718_s23, 128  }
 0x476   : > { %1134 = vsyncadd (%p874_p11), %s718_s23, 4294967168  ;;  %s1452_s29 = sld [smem:[#allocation17_spill]]  ;;  %p23_p0 = scmp.ge.s32.totalorder %s1248_s16, 4  }
 0x477   : > { %s1453_s23 = sld [smem:[#allocation18_spill]]  ;;  %s1454_s21 = smov %s1141_s22 }
 0x478   : > { %s1456_s24 = smov %s1248_s16  ;;  %25 = sbr.rel (!%p23_p0) target bundleno = 11 (0xb), region = 110 }
 0x47c   : > { %s1455_s22 = smov %s1452_s29 }
 0x47d   :  { %724 = vsyncpa [#allocation4], 1 }
 0x47e   :  { %726 = vsyncpa [#allocation4 + $0x1], 1 }
 0x47f   :  { %727 = vsyncpa [#allocation7], 1 }
 0x480   :  { %729 = vsyncpa [#allocation7 + $0x1], 1 }
 0x481   :  { %730 = vsyncpa [#allocation10], 1 }
 0x482   :  { %731 = vsyncpa [#allocation5], 1 }
 0x483   :  { %733 = vsyncpa [#allocation5 + $0x1], 1 }

</bundles_post_ra>
